<compile_context>
chip_gen: v7x
topology: tpu7x:2x2x1
jax: 0.10.0
libtpu: 0.0.40
codegen_flags: <defaults>
</compile_context>

<pallas_src>
import math
import functools

import jax
import jax.numpy as jnp
from jax import lax
from jax.experimental import pallas as pl
from jax.experimental.pallas import tpu as pltpu


# bf16 operands + f32 accumulation for all MXU dots (v6e/v7x feedback).
COMPUTE_DTYPE = jnp.bfloat16


# ----------------------------------------------------------------------------
# Fused MHA kernel: one (batch) tile per grid step.
# ----------------------------------------------------------------------------

def _mha_fused_kernel(x_ref, wqkv_ref, bqkv_ref, wo_ref, bo_ref, o_ref, *,
                      n_head, d_k, scale):
    # x_ref:    (3, S, D)  stacked [query; key; value] activations of this batch
    # wqkv_ref: (3, D, D)  stacked [Wq; Wk; Wv] (stored (in, out))
    # bqkv_ref: (3, 1, D)
    # wo_ref:   (D, D), bo_ref: (1, D)
    # o_ref:    (S, D)
    cdt = COMPUTE_DTYPE

    # --- Q/K/V projections: one batched MXU pass over the stacked weights ----
    x = x_ref[...].astype(cdt)                       # (3, S, D)
    w = wqkv_ref[...].astype(cdt)                    # (3, D, D)
    qkv = lax.dot_general(
        x, w,
        dimension_numbers=(((2,), (1,)), ((0,), (0,))),
        preferred_element_type=jnp.float32,
    ) + bqkv_ref[...]                                # (3, S, D) f32

    q = qkv[0] * scale                               # scale Q, not the scores
    k = qkv[1]
    v = qkv[2]

    # --- per-head scaled-dot-product attention (n_head is small & static) ----
    ctx_heads = []
    for h in range(n_head):
        lo, hi = h * d_k, (h + 1) * d_k
        q_h = q[:, lo:hi].astype(cdt)                # (S, d_k)
        k_h = k[:, lo:hi].astype(cdt)                # (S, d_k)
        v_h = v[:, lo:hi].astype(cdt)                # (S, d_k)

        # scores: contract over d_k -> no explicit k.T relayout
        s = lax.dot_general(
            q_h, k_h,
            dimension_numbers=(((1,), (1,)), ((), ())),
            preferred_element_type=jnp.float32)      # (S, S)

        # numerically stable row-wise softmax
        m = jnp.max(s, axis=-1, keepdims=True)
        p = jnp.exp(s - m)
        p = p * pl.reciprocal(jnp.sum(p, axis=-1, keepdims=True), approx=True)

        ctx_heads.append(
            jnp.dot(p.astype(cdt), v_h, preferred_element_type=jnp.float32))

    ctx = jnp.concatenate(ctx_heads, axis=-1)        # (S, D)

    # --- output projection -----------------------------------------------------
    o_ref[...] = (
        jnp.dot(ctx.astype(cdt), wo_ref[...].astype(cdt),
                preferred_element_type=jnp.float32)
        + bo_ref[...]
    )


def multi_head_attention(query, key, value, params, n_head):
    """query/key/value: (B, S, D) float32. Returns (B, S, D) float32."""
    B, S, D = query.shape
    d_k = D // n_head
    scale = 1.0 / math.sqrt(d_k)

    # Pack inputs / QKV weights so the kernel does one batched projection dot.
    x = jnp.stack([query, key, value], axis=0)                         # (3,B,S,D)
    w_qkv = jnp.stack([params["wq"], params["wk"], params["wv"]], 0)   # (3,D,D)
    b_qkv = jnp.stack([params["bq"], params["bk"], params["bv"]], 0)   # (3,D)
    b_qkv = b_qkv.reshape(3, 1, D)
    wo = params["wo"]
    bo = params["bo"].reshape(1, D)

    kernel = functools.partial(_mha_fused_kernel,
                               n_head=n_head, d_k=d_k, scale=scale)

    return pl.pallas_call(
        kernel,
        out_shape=jax.ShapeDtypeStruct((B, S, D), jnp.float32),
        grid=(B,),
        in_specs=[
            # per-batch activations (heads are split inside the kernel)
            pl.BlockSpec((3, None, S, D), lambda b: (0, b, 0, 0)),
            # weights / biases: resident across all grid steps
            pl.BlockSpec((3, D, D), lambda b: (0, 0, 0)),
            pl.BlockSpec((3, 1, D), lambda b: (0, 0, 0)),
            pl.BlockSpec((D, D), lambda b: (0, 0)),
            pl.BlockSpec((1, D), lambda b: (0, 0)),
        ],
        out_specs=pl.BlockSpec((None, S, D), lambda b: (b, 0, 0)),
        compiler_params=pltpu.CompilerParams(
            dimension_semantics=("parallel",),   # B=2 -> shards over v7x's 2 TCs
        ),
    )(x, w_qkv, b_qkv, wo, bo)


# ----------------------------------------------------------------------------
# Pure-JAX (f32) reference for verification
# ----------------------------------------------------------------------------

def reference_mha(query, key, value, params, n_head):
    B, S, D = query.shape
    d_k = D // n_head

    def lin(x, w, b):
        return x @ w + b

    def project(x, w, b):
        return lin(x, w, b).reshape(B, S, n_head, d_k).transpose(0, 2, 1, 3)

    q = project(query, params["wq"], params["bq"])
    k = project(key, params["wk"], params["bk"])
    v = project(value, params["wv"], params["bv"])

    s = jnp.einsum("bhqd,bhkd->bhqk", q, k) / math.sqrt(d_k)
    p = jax.nn.softmax(s, axis=-1)
    ctx = jnp.einsum("bhqk,bhkd->bhqd", p, v)
    ctx = ctx.transpose(0, 2, 1, 3).reshape(B, S, D)
    return lin(ctx, params["wo"], params["bo"])


# ----------------------------------------------------------------------------
# Params (weights stored as (in, out) so forward is x @ W + b)
# ----------------------------------------------------------------------------

def init_params(key, dim):
    keys = jax.random.split(key, 8)
    scale = 1.0 / math.sqrt(dim)

    def linear_params(kw, kb):
        w = jax.random.uniform(kw, (dim, dim), jnp.float32, -scale, scale)
        b = jax.random.uniform(kb, (dim,), jnp.float32, -scale, scale)
        return w, b

    wq, bq = linear_params(keys[0], keys[1])
    wk, bk = linear_params(keys[2], keys[3])
    wv, bv = linear_params(keys[4], keys[5])
    wo, bo = linear_params(keys[6], keys[7])
    return dict(wq=wq, bq=bq, wk=wk, bk=bk, wv=wv, bv=bv, wo=wo, bo=bo)


# ----------------------------------------------------------------------------
# Main
# ----------------------------------------------------------------------------

if __name__ == "__main__":
    B, S, D, H = 2, 8, 32, 4   # batch, seq, hidden dim, heads (d_k = 8)

    root = jax.random.PRNGKey(0)
    k_params, k_q, k_k, k_v = jax.random.split(root, 4)

    params = init_params(k_params, D)
    query = jax.random.normal(k_q, (B, S, D), jnp.float32)
    key_in = jax.random.normal(k_k, (B, S, D), jnp.float32)
    value = jax.random.normal(k_v, (B, S, D), jnp.float32)

    out = multi_head_attention(query, key_in, value, params, H)
    out = jax.block_until_ready(out)

    ref = reference_mha(query, key_in, value, params, H)
    assert out.shape == (B, S, D)
    # bf16 matmul operands (f32 accumulation) + approx reciprocal => loosened tol.
    assert jnp.allclose(out, ref, atol=5e-2, rtol=5e-2), "mismatch vs reference"

    print("KERNEL_OK")
</pallas_src>

<mosaic_0001>
module attributes {stable_mosaic.version = 11 : i64} {
  func.func @_mha_fused_kernel(%arg0: i32, %arg1: memref<3x1x8x32xf32, #tpu.memory_space<vmem>>, %arg2: memref<3x32x32xf32, #tpu.memory_space<vmem>>, %arg3: memref<3x1x32xf32, #tpu.memory_space<vmem>>, %arg4: memref<32x32xf32, #tpu.memory_space<vmem>>, %arg5: memref<1x32xf32, #tpu.memory_space<vmem>>, %arg6: memref<1x8x32xf32, #tpu.memory_space<vmem>>) attributes {dimension_semantics = [#tpu.dimension_semantics<parallel>], iteration_bounds = array<i64: 2>, scalar_prefetch = 0 : i64, scratch_operands = 0 : i64, tpu.core_type = #tpu.core_type<tc>, window_params = [{transform_indices = @transform_0, window_bounds = array<i64: 3, 1, 8, 32>}, {pipeline_mode = #tpu.pipeline_mode<synchronous>, transform_indices = @transform_1, window_bounds = array<i64: 3, 32, 32>}, {pipeline_mode = #tpu.pipeline_mode<synchronous>, transform_indices = @transform_2, window_bounds = array<i64: 3, 1, 32>}, {pipeline_mode = #tpu.pipeline_mode<synchronous>, transform_indices = @transform_3, window_bounds = array<i64: 32, 32>}, {pipeline_mode = #tpu.pipeline_mode<synchronous>, transform_indices = @transform_4, window_bounds = array<i64: 1, 32>}, {transform_indices = @transform_5, window_bounds = array<i64: 1, 8, 32>}]} {
    %c0 = arith.constant 0 : index
    %c0_0 = arith.constant 0 : index
    %c0_1 = arith.constant 0 : index
    %c0_2 = arith.constant 0 : index
    %0 = vector.load %arg1[%c0, %c0_0, %c0_1, %c0_2] : memref<3x1x8x32xf32, #tpu.memory_space<vmem>>, vector<3x1x8x32xf32>
    %1 = vector.shape_cast %0 : vector<3x1x8x32xf32> to vector<3x8x32xf32>
    %2 = arith.truncf %1 : vector<3x8x32xf32> to vector<3x8x32xbf16>
    %c0_3 = arith.constant 0 : index
    %c0_4 = arith.constant 0 : index
    %c0_5 = arith.constant 0 : index
    %3 = vector.load %arg2[%c0_3, %c0_4, %c0_5] : memref<3x32x32xf32, #tpu.memory_space<vmem>>, vector<3x32x32xf32>
    %4 = arith.truncf %3 : vector<3x32x32xf32> to vector<3x32x32xbf16>
    %cst = arith.constant dense<0.000000e+00> : vector<3x8x32xf32>
    %5 = tpu.matmul %2, %4, %cst {dimension_numbers = #tpu.dot_dimension_numbers<[2], [1], [1], [2], [0, 0, 0, 1, 1, 2], [0], [0]>} : vector<3x8x32xbf16>, vector<3x32x32xbf16>, vector<3x8x32xf32> -> vector<3x8x32xf32>
    %c0_6 = arith.constant 0 : index
    %c0_7 = arith.constant 0 : index
    %c0_8 = arith.constant 0 : index
    %6 = vector.load %arg3[%c0_6, %c0_7, %c0_8] : memref<3x1x32xf32, #tpu.memory_space<vmem>>, vector<3x1x32xf32>
    %7 = vector.broadcast %6 : vector<3x1x32xf32> to vector<3x8x32xf32>
    %8 = arith.addf %5, %7 : vector<3x8x32xf32>
    %9 = vector.extract_strided_slice %8 {offsets = [0, 0, 0], sizes = [1, 8, 32], strides = [1, 1, 1]} : vector<3x8x32xf32> to vector<1x8x32xf32>
    %10 = vector.shape_cast %9 : vector<1x8x32xf32> to vector<8x32xf32>
    %cst_9 = arith.constant 0.353553385 : f32
    %11 = vector.broadcast %cst_9 : f32 to vector<8x32xf32>
    %12 = arith.mulf %10, %11 : vector<8x32xf32>
    %13 = vector.extract_strided_slice %8 {offsets = [1, 0, 0], sizes = [1, 8, 32], strides = [1, 1, 1]} : vector<3x8x32xf32> to vector<1x8x32xf32>
    %14 = vector.shape_cast %13 : vector<1x8x32xf32> to vector<8x32xf32>
    %15 = vector.extract_strided_slice %8 {offsets = [2, 0, 0], sizes = [1, 8, 32], strides = [1, 1, 1]} : vector<3x8x32xf32> to vector<1x8x32xf32>
    %16 = vector.shape_cast %15 : vector<1x8x32xf32> to vector<8x32xf32>
    %17 = vector.extract_strided_slice %12 {offsets = [0, 0], sizes = [8, 8], strides = [1, 1]} : vector<8x32xf32> to vector<8x8xf32>
    %18 = arith.truncf %17 : vector<8x8xf32> to vector<8x8xbf16>
    %19 = vector.extract_strided_slice %14 {offsets = [0, 0], sizes = [8, 8], strides = [1, 1]} : vector<8x32xf32> to vector<8x8xf32>
    %20 = arith.truncf %19 : vector<8x8xf32> to vector<8x8xbf16>
    %21 = vector.extract_strided_slice %16 {offsets = [0, 0], sizes = [8, 8], strides = [1, 1]} : vector<8x32xf32> to vector<8x8xf32>
    %22 = arith.truncf %21 : vector<8x8xf32> to vector<8x8xbf16>
    %cst_10 = arith.constant dense<0.000000e+00> : vector<8x8xf32>
    %23 = tpu.matmul %18, %20, %cst_10 {dimension_numbers = #tpu.dot_dimension_numbers<[1], [1], [0], [0], [0, 0, 1, 0], [], []>} : vector<8x8xbf16>, vector<8x8xbf16>, vector<8x8xf32> -> vector<8x8xf32>
    %cst_11 = arith.constant dense<0xFF800000> : vector<8xf32>
    %24 = vector.multi_reduction <maximumf>, %23, %cst_11 [1] : vector<8x8xf32> to vector<8xf32>
    %25 = vector.shape_cast %24 : vector<8xf32> to vector<8x1xf32>
    %26 = vector.broadcast %25 : vector<8x1xf32> to vector<8x8xf32>
    %27 = arith.subf %23, %26 : vector<8x8xf32>
    %28 = math.exp %27 : vector<8x8xf32>
    %cst_12 = arith.constant dense<0.000000e+00> : vector<8xf32>
    %29 = vector.multi_reduction <add>, %28, %cst_12 [1] : vector<8x8xf32> to vector<8xf32>
    %30 = vector.shape_cast %29 : vector<8xf32> to vector<8x1xf32>
    %31 = tpu.reciprocal %30 {approx = true} : vector<8x1xf32> -> vector<8x1xf32>
    %32 = vector.broadcast %31 : vector<8x1xf32> to vector<8x8xf32>
    %33 = arith.mulf %28, %32 : vector<8x8xf32>
    %34 = arith.truncf %33 : vector<8x8xf32> to vector<8x8xbf16>
    %cst_13 = arith.constant dense<0.000000e+00> : vector<8x8xf32>
    %35 = tpu.matmul %34, %22, %cst_13 {dimension_numbers = #tpu.dot_dimension_numbers<[1], [0], [0], [1], [0, 0, 1, 1], [], []>} : vector<8x8xbf16>, vector<8x8xbf16>, vector<8x8xf32> -> vector<8x8xf32>
    %36 = vector.extract_strided_slice %12 {offsets = [0, 8], sizes = [8, 8], strides = [1, 1]} : vector<8x32xf32> to vector<8x8xf32>
    %37 = arith.truncf %36 : vector<8x8xf32> to vector<8x8xbf16>
    %38 = vector.extract_strided_slice %14 {offsets = [0, 8], sizes = [8, 8], strides = [1, 1]} : vector<8x32xf32> to vector<8x8xf32>
    %39 = arith.truncf %38 : vector<8x8xf32> to vector<8x8xbf16>
    %40 = vector.extract_strided_slice %16 {offsets = [0, 8], sizes = [8, 8], strides = [1, 1]} : vector<8x32xf32> to vector<8x8xf32>
    %41 = arith.truncf %40 : vector<8x8xf32> to vector<8x8xbf16>
    %cst_14 = arith.constant dense<0.000000e+00> : vector<8x8xf32>
    %42 = tpu.matmul %37, %39, %cst_14 {dimension_numbers = #tpu.dot_dimension_numbers<[1], [1], [0], [0], [0, 0, 1, 0], [], []>} : vector<8x8xbf16>, vector<8x8xbf16>, vector<8x8xf32> -> vector<8x8xf32>
    %cst_15 = arith.constant dense<0xFF800000> : vector<8xf32>
    %43 = vector.multi_reduction <maximumf>, %42, %cst_15 [1] : vector<8x8xf32> to vector<8xf32>
    %44 = vector.shape_cast %43 : vector<8xf32> to vector<8x1xf32>
    %45 = vector.broadcast %44 : vector<8x1xf32> to vector<8x8xf32>
    %46 = arith.subf %42, %45 : vector<8x8xf32>
    %47 = math.exp %46 : vector<8x8xf32>
    %cst_16 = arith.constant dense<0.000000e+00> : vector<8xf32>
    %48 = vector.multi_reduction <add>, %47, %cst_16 [1] : vector<8x8xf32> to vector<8xf32>
    %49 = vector.shape_cast %48 : vector<8xf32> to vector<8x1xf32>
    %50 = tpu.reciprocal %49 {approx = true} : vector<8x1xf32> -> vector<8x1xf32>
    %51 = vector.broadcast %50 : vector<8x1xf32> to vector<8x8xf32>
    %52 = arith.mulf %47, %51 : vector<8x8xf32>
    %53 = arith.truncf %52 : vector<8x8xf32> to vector<8x8xbf16>
    %cst_17 = arith.constant dense<0.000000e+00> : vector<8x8xf32>
    %54 = tpu.matmul %53, %41, %cst_17 {dimension_numbers = #tpu.dot_dimension_numbers<[1], [0], [0], [1], [0, 0, 1, 1], [], []>} : vector<8x8xbf16>, vector<8x8xbf16>, vector<8x8xf32> -> vector<8x8xf32>
    %55 = vector.extract_strided_slice %12 {offsets = [0, 16], sizes = [8, 8], strides = [1, 1]} : vector<8x32xf32> to vector<8x8xf32>
    %56 = arith.truncf %55 : vector<8x8xf32> to vector<8x8xbf16>
    %57 = vector.extract_strided_slice %14 {offsets = [0, 16], sizes = [8, 8], strides = [1, 1]} : vector<8x32xf32> to vector<8x8xf32>
    %58 = arith.truncf %57 : vector<8x8xf32> to vector<8x8xbf16>
    %59 = vector.extract_strided_slice %16 {offsets = [0, 16], sizes = [8, 8], strides = [1, 1]} : vector<8x32xf32> to vector<8x8xf32>
    %60 = arith.truncf %59 : vector<8x8xf32> to vector<8x8xbf16>
    %cst_18 = arith.constant dense<0.000000e+00> : vector<8x8xf32>
    %61 = tpu.matmul %56, %58, %cst_18 {dimension_numbers = #tpu.dot_dimension_numbers<[1], [1], [0], [0], [0, 0, 1, 0], [], []>} : vector<8x8xbf16>, vector<8x8xbf16>, vector<8x8xf32> -> vector<8x8xf32>
    %cst_19 = arith.constant dense<0xFF800000> : vector<8xf32>
    %62 = vector.multi_reduction <maximumf>, %61, %cst_19 [1] : vector<8x8xf32> to vector<8xf32>
    %63 = vector.shape_cast %62 : vector<8xf32> to vector<8x1xf32>
    %64 = vector.broadcast %63 : vector<8x1xf32> to vector<8x8xf32>
    %65 = arith.subf %61, %64 : vector<8x8xf32>
    %66 = math.exp %65 : vector<8x8xf32>
    %cst_20 = arith.constant dense<0.000000e+00> : vector<8xf32>
    %67 = vector.multi_reduction <add>, %66, %cst_20 [1] : vector<8x8xf32> to vector<8xf32>
    %68 = vector.shape_cast %67 : vector<8xf32> to vector<8x1xf32>
    %69 = tpu.reciprocal %68 {approx = true} : vector<8x1xf32> -> vector<8x1xf32>
    %70 = vector.broadcast %69 : vector<8x1xf32> to vector<8x8xf32>
    %71 = arith.mulf %66, %70 : vector<8x8xf32>
    %72 = arith.truncf %71 : vector<8x8xf32> to vector<8x8xbf16>
    %cst_21 = arith.constant dense<0.000000e+00> : vector<8x8xf32>
    %73 = tpu.matmul %72, %60, %cst_21 {dimension_numbers = #tpu.dot_dimension_numbers<[1], [0], [0], [1], [0, 0, 1, 1], [], []>} : vector<8x8xbf16>, vector<8x8xbf16>, vector<8x8xf32> -> vector<8x8xf32>
    %74 = vector.extract_strided_slice %12 {offsets = [0, 24], sizes = [8, 8], strides = [1, 1]} : vector<8x32xf32> to vector<8x8xf32>
    %75 = arith.truncf %74 : vector<8x8xf32> to vector<8x8xbf16>
    %76 = vector.extract_strided_slice %14 {offsets = [0, 24], sizes = [8, 8], strides = [1, 1]} : vector<8x32xf32> to vector<8x8xf32>
    %77 = arith.truncf %76 : vector<8x8xf32> to vector<8x8xbf16>
    %78 = vector.extract_strided_slice %16 {offsets = [0, 24], sizes = [8, 8], strides = [1, 1]} : vector<8x32xf32> to vector<8x8xf32>
    %79 = arith.truncf %78 : vector<8x8xf32> to vector<8x8xbf16>
    %cst_22 = arith.constant dense<0.000000e+00> : vector<8x8xf32>
    %80 = tpu.matmul %75, %77, %cst_22 {dimension_numbers = #tpu.dot_dimension_numbers<[1], [1], [0], [0], [0, 0, 1, 0], [], []>} : vector<8x8xbf16>, vector<8x8xbf16>, vector<8x8xf32> -> vector<8x8xf32>
    %cst_23 = arith.constant dense<0xFF800000> : vector<8xf32>
    %81 = vector.multi_reduction <maximumf>, %80, %cst_23 [1] : vector<8x8xf32> to vector<8xf32>
    %82 = vector.shape_cast %81 : vector<8xf32> to vector<8x1xf32>
    %83 = vector.broadcast %82 : vector<8x1xf32> to vector<8x8xf32>
    %84 = arith.subf %80, %83 : vector<8x8xf32>
    %85 = math.exp %84 : vector<8x8xf32>
    %cst_24 = arith.constant dense<0.000000e+00> : vector<8xf32>
    %86 = vector.multi_reduction <add>, %85, %cst_24 [1] : vector<8x8xf32> to vector<8xf32>
    %87 = vector.shape_cast %86 : vector<8xf32> to vector<8x1xf32>
    %88 = tpu.reciprocal %87 {approx = true} : vector<8x1xf32> -> vector<8x1xf32>
    %89 = vector.broadcast %88 : vector<8x1xf32> to vector<8x8xf32>
    %90 = arith.mulf %85, %89 : vector<8x8xf32>
    %91 = arith.truncf %90 : vector<8x8xf32> to vector<8x8xbf16>
    %cst_25 = arith.constant dense<0.000000e+00> : vector<8x8xf32>
    %92 = tpu.matmul %91, %79, %cst_25 {dimension_numbers = #tpu.dot_dimension_numbers<[1], [0], [0], [1], [0, 0, 1, 1], [], []>} : vector<8x8xbf16>, vector<8x8xbf16>, vector<8x8xf32> -> vector<8x8xf32>
    %93 = tpu.concatenate %35, %54, %73, %92 in 1 : vector<8x8xf32>, vector<8x8xf32>, vector<8x8xf32>, vector<8x8xf32> -> vector<8x32xf32>
    %94 = arith.truncf %93 : vector<8x32xf32> to vector<8x32xbf16>
    %c0_26 = arith.constant 0 : index
    %c0_27 = arith.constant 0 : index
    %95 = vector.load %arg4[%c0_26, %c0_27] : memref<32x32xf32, #tpu.memory_space<vmem>>, vector<32x32xf32>
    %96 = arith.truncf %95 : vector<32x32xf32> to vector<32x32xbf16>
    %cst_28 = arith.constant dense<0.000000e+00> : vector<8x32xf32>
    %97 = tpu.matmul %94, %96, %cst_28 {dimension_numbers = #tpu.dot_dimension_numbers<[1], [0], [0], [1], [0, 0, 1, 1], [], []>} : vector<8x32xbf16>, vector<32x32xbf16>, vector<8x32xf32> -> vector<8x32xf32>
    %c0_29 = arith.constant 0 : index
    %c0_30 = arith.constant 0 : index
    %98 = vector.load %arg5[%c0_29, %c0_30] : memref<1x32xf32, #tpu.memory_space<vmem>>, vector<1x32xf32>
    %99 = vector.broadcast %98 : vector<1x32xf32> to vector<8x32xf32>
    %100 = arith.addf %97, %99 : vector<8x32xf32>
    %c0_31 = arith.constant 0 : index
    %c0_32 = arith.constant 0 : index
    %c0_33 = arith.constant 0 : index
    %101 = vector.load %arg6[%c0_31, %c0_32, %c0_33] : memref<1x8x32xf32, #tpu.memory_space<vmem>>, vector<1x8x32xf32>
    %102 = vector.shape_cast %101 : vector<1x8x32xf32> to vector<8x32xf32>
    %103 = vector.shape_cast %100 : vector<8x32xf32> to vector<1x8x32xf32>
    tpu.vector_store %arg6[%c0_31, %c0_32, %c0_33], %103 {strides = array<i32>} : memref<1x8x32xf32, #tpu.memory_space<vmem>>, vector<1x8x32xf32>,
    return
  }
  func.func @transform_0(%arg0: i32) -> (i32, i32, i32, i32) {
    %c0_i32 = arith.constant 0 : i32
    %c0_i32_0 = arith.constant 0 : i32
    %c0_i32_1 = arith.constant 0 : i32
    %c0_i32_2 = arith.constant 0 : i32
    return %c0_i32, %arg0, %c0_i32_0, %c0_i32_1 : i32, i32, i32, i32
  }
  func.func @transform_1(%arg0: i32) -> (i32, i32, i32) {
    %c0_i32 = arith.constant 0 : i32
    %c0_i32_0 = arith.constant 0 : i32
    %c0_i32_1 = arith.constant 0 : i32
    %c0_i32_2 = arith.constant 0 : i32
    return %c0_i32, %c0_i32_0, %c0_i32_1 : i32, i32, i32
  }
  func.func @transform_2(%arg0: i32) -> (i32, i32, i32) {
    %c0_i32 = arith.constant 0 : i32
    %c0_i32_0 = arith.constant 0 : i32
    %c0_i32_1 = arith.constant 0 : i32
    %c0_i32_2 = arith.constant 0 : i32
    return %c0_i32, %c0_i32_0, %c0_i32_1 : i32, i32, i32
  }
  func.func @transform_3(%arg0: i32) -> (i32, i32) {
    %c0_i32 = arith.constant 0 : i32
    %c0_i32_0 = arith.constant 0 : i32
    %c0_i32_1 = arith.constant 0 : i32
    return %c0_i32, %c0_i32_0 : i32, i32
  }
  func.func @transform_4(%arg0: i32) -> (i32, i32) {
    %c0_i32 = arith.constant 0 : i32
    %c0_i32_0 = arith.constant 0 : i32
    %c0_i32_1 = arith.constant 0 : i32
    return %c0_i32, %c0_i32_0 : i32, i32
  }
  func.func @transform_5(%arg0: i32) -> (i32, i32, i32) {
    %c0_i32 = arith.constant 0 : i32
    %c0_i32_0 = arith.constant 0 : i32
    %c0_i32_1 = arith.constant 0 : i32
    return %arg0, %c0_i32, %c0_i32_0 : i32, i32, i32
  }
}

</mosaic_0001>

<bundles_post_ra>
// kernel: tpu_custom_call.1
= control target key start
LH: loop header
LB: loop body
LE: loop exit
PB: predicated region body
PF: predicated region fallthrough
CT: control target
= control target key end

     0   :  { %10 = vsyncpa [#allocation3], 0  ;;  %s1834_s0 = inlined_call_operand.hbm [shape: f32[3,2,8,32], index: 0, kind: input, shape index: {}]   ;;  %s1835_s1 = inlined_call_operand.hbm [shape: f32[3,32,32], index: 1, kind: input, shape index: {}]   ;;  %s1836_s2 = inlined_call_operand.vmem [shape: f32[3,1,32], index: 2, kind: input, shape index: {}]   ;;  %s1837_s3 = inlined_call_operand.hbm [shape: f32[32,32], index: 3, kind: input, shape index: {}]   ;;  %s1838_s4 = inlined_call_operand.vmem [shape: f32[1,32], index: 4, kind: input, shape index: {}]   ;;  %s1839_s5 = inlined_call_operand.hbm [shape: f32[2,8,32], index: 5, kind: output, shape index: {}]  }
   0x1   :  { %12 = vsyncpa [#allocation3 + $0x1], 0 }
   0x2   :  { %13 = vsyncpa [#allocation6], 0 }
   0x3   :  { %14 = vsyncpa [#allocation4], 0 }
   0x4   :  { %16 = vsyncpa [#allocation4 + $0x1], 0  ;;  %s1505_s18 = smov 0   ;;  %s1507_s19 = smov 0  }
   0x5   :  { %s1509_s20 = smov 0   ;;  %s1511_s21 = smov 0  }
   0x6 LB: > { %s1526_s22 = sadd.s32 4294967295, %s1458_s21   ;;  %s1068_s23 = sadd.s32 4294967294, %s1458_s21   ;;  %s1458_s21 = sphi %s1511_s21, %s1867_s21   ;;  %s1454_s20 = sphi %s1509_s20, %s1866_s20   ;;  %s1450_s19 = sphi %s1507_s19, %s1865_s19   ;;  %s1446_s18 = sphi %s1505_s18, %s1864_s18  }
   0x7   : > { %s1530_s24 = sadd.s32 1, %s1458_s21   ;;  %s29_s25 = sadd.s32 1, %s1454_s20 }
   0x8   : > { %s26_s26 = ssub.s32 %s1458_s21, %s1530_s24  ;;  %p36_p0 = scmp.ne.s32.totalorder %s1454_s20, %s1450_s19 }
   0x9   : > { %p27_p1 = scmp.eq.s32.totalorder %s26_s26, 0  ;;  %p37_p2 = scmp.eq.s32.totalorder %s1458_s21, 0 }
   0xa   : > { %p42_p3 = scmp.ne.s32.totalorder %s1450_s19, %s1446_s18  ;;  %p1840_p4 = scmp.eq.s32.totalorder %s1526_s22, 0 }
   0xb   : > { %s1542_s27 = scalar_select %p27_p1, %s1454_s20, %s29_s25  }
   0xc   : > { %p1544_p5 = por %p37_p2, %p36_p0  ;;  %p1550_p6 = por %p1840_p4, %p42_p3 }
   0xd   : > { %p150_p7 = scmp.eq.s32.totalorder %s1526_s22, 1  ;;  %p156_p8 = scmp.eq.s32.totalorder %s1068_s23, 1 }
   0xe   : > { %s1846_s28 = scalar_select %p1544_p5, 1, 0 }
   0xf   : > { %s1847_s29 = scalar_select %p1550_p6, 1, 0 }
  0x10   : > { %p1069_p9 = scmp.ge.s32.totalorder %s1458_s21, 1  ;;  %p163_p10 = scmp.lt.s32.totalorder %s1458_s21, 3 }
  0x11   : > { %p1557_p11 = por %p150_p7, %p36_p0  ;;  %p1561_p12 = por %p156_p8, %p42_p3 }
  0x12   : > { %p1565_p13 = pnand %p1069_p9, %p163_p10  ;;  %s1460_s8 = smov [#allocation5]  }
  0x13   : > { %s1848_s30 = scalar_select %p1557_p11, 1, 0 }
  0x14   : > { %s1849_s6 = scalar_select %p1561_p12, 1, 0 }
  0x15   : > { %s1850_s7 = scalar_select %p1565_p13, 1, 0 }
  0x16   : > { %p1220_p1 = pneg %p1565_p13  ;;  %s175_s9 = sshll.u32 %s1460_s8, 4  ;;  %s176_s9 = int_to_ptr.vmem [resolvable:$true] %s175_s9 }
  0x17   : > { %s1461_s11 = smov [#allocation7]   ;;  %s1302_s15 = scalar_lea.hbm %s1835_s1, 1536 }
  0x18   : > { %p1573_p2 = pnand %p1220_p1, %p1840_p4  ;;  %s191_s12 = sshll.u32 %s1461_s11, 4  ;;  %s192_s12 = int_to_ptr.vmem [resolvable:$true] %s191_s12 }
  0x19   : > { %p1303_p7 = scmp.ne.s32.totalorder %s1835_s1, %s1302_s15  ;;  %p1309_p1 = scmp.lt.u32.totalorder %s1302_s15, %s1835_s1 }
  0x1a   : > { %p1304_p8 = pneg %p1573_p2 }
  0x1c   : > { %p1305_p9 = pnand %p1304_p8, %p1303_p7 }
  0x1e   : > { %p1306_p10 = pneg %p1305_p9 }
  0x20   : > { %p1311_p0 = pnand %p1309_p1, %p1306_p10 }
  0x22   : > { %1314 = shalt.err (!%p1311_p0)
}
  0x23   : > { %s1315_s26 = scalar_lea.vmem %s176_s9, 1536  ;;  %p1323_p11 = scmp.lt.s32.totalorder %s176_s9, %s176_s9 }
  0x24   : > { %p1316_p4 = scmp.ne.s32.totalorder %s176_s9, %s1315_s26  ;;  %p1324_p6 = scmp.lt.s32.totalorder %s1315_s26, %s1315_s26 }
  0x26   : > { %p1318_p3 = pnand %p1316_p4, %p1304_p8  ;;  %p1325_p13 = por %p1324_p6, %p1323_p11 }
  0x28   : > { %p1319_p12 = pneg %p1318_p3 }
  0x2a   : > { %p1326_p5 = pnand %p1325_p13, %p1319_p12 }
  0x2c   : > { %1329 = shalt.err (!%p1326_p5)
}
  0x2d   : > { %s1845_s8 = smov 128   ;;  %s1463_s11 = smov 8  }
  0x2e   : > { %1223 = dma.hbm_to_vmem [thread:$0]  (!%p1573_p2), %s1835_s1, 1536, %s176_s9, [#allocation6], %s1845_s8, %s1845_s8, %s1463_s11  }
  0x2f   : > { %p1852_p4 = scmp.ne.s32.totalorder %s1846_s28, 0  ;;  %p1853_p0 = scmp.lt.s32.totalorder %s1458_s21, 2 }
  0x30   : > { %s1330_s23 = scalar_lea.hbm %s1837_s3, 512 }
  0x31   : > { %p1608_p3 = pnand %p1853_p0, %p1852_p4  ;;  %p1331_p5 = scmp.ne.s32.totalorder %s1837_s3, %s1330_s23 }
  0x32   : > { %p1337_p12 = scmp.lt.u32.totalorder %s1330_s23, %s1837_s3 }
  0x33   : > { %s1854_s15 = scalar_select %p1608_p3, 1, 0 }
  0x34   : > { %p1333_p6 = pnand %p1331_p5, %p1304_p8 }
  0x36   : > { %p1334_p11 = pneg %p1333_p6 }
  0x38   : > { %p1339_p13 = pnand %p1337_p12, %p1334_p11 }
  0x3a   : > { %1342 = shalt.err (!%p1339_p13)
}
  0x3b   : > { %s1343_s13 = scalar_lea.vmem %s192_s12, 512  ;;  %p1351_p1 = scmp.lt.s32.totalorder %s192_s12, %s192_s12 }
  0x3c   : > { %p1344_p7 = scmp.ne.s32.totalorder %s192_s12, %s1343_s13  ;;  %p1352_p4 = scmp.lt.s32.totalorder %s1343_s13, %s1343_s13 }
  0x3e   : > { %p1346_p9 = pnand %p1344_p7, %p1304_p8  ;;  %p1353_p0 = por %p1352_p4, %p1351_p1 }
  0x40   : > { %p1347_p10 = pneg %p1346_p9 }
  0x42   : > { %p1354_p3 = pnand %p1353_p0, %p1347_p10 }
  0x44   : > { %1357 = shalt.err (!%p1354_p3)
}
  0x45   : > { %1226 = dma.hbm_to_vmem [thread:$0]  (!%p1573_p2), %s1837_s3, 512, %s192_s12, [#allocation6], %s1845_s8, %s1845_s8, %s1463_s11  }
  0x46   : > { %s208_s17 = sand.u32 1, %s1454_s20   ;;  %s1073_s25 = sshll.u32 %s1458_s21, 7 }
  0x47   : > { %s1206_s23 = smul.u32 24, %s208_s17  ;;  %s1640_s28 = scalar_lea.hbm %s1834_s0, %s1073_s25 }
  0x48   : > { %s1644_s14 = scalar_lea.sflag [#allocation3], %s208_s17  ;;  %s1358_s16 = scalar_lea.hbm %s1640_s28, 384 }
  0x49   : > { %s212_s10 = scalar_lea.vmem [#allocation2], %s1206_s23  ;;  %p1359_p2 = scmp.ne.s32.totalorder %s1640_s28, %s1358_s16 }
  0x4a   : > { %s218_s13 = sshll.u32 %s212_s10, 4  ;;  %p1855_p8 = scmp.ne.s32.totalorder %s1854_s15, 0  ;;  %s1642_s13 = int_to_ptr.vmem [resolvable:$true] %s218_s13 }
  0x4b   : > { %s1363_s26 = scalar_lea.hbm %s1834_s0, 768  ;;  %p1364_p11 = scmp.lt.u32.totalorder %s1640_s28, %s1834_s0 }
  0x4c   : > { %p1360_p3 = pneg %p1855_p8  ;;  %p1365_p12 = scmp.lt.u32.totalorder %s1363_s26, %s1358_s16 }
  0x4d   : > { %p1367_p7 = scmp.lt.u32.totalorder %s1358_s16, %s1640_s28 }
  0x4e   : > { %p1361_p5 = pnand %p1360_p3, %p1359_p2  ;;  %p1366_p13 = por %p1365_p12, %p1364_p11 }
  0x50   : > { %p1362_p6 = pneg %p1361_p5  ;;  %p1368_p9 = por %p1367_p7, %p1366_p13 }
  0x52   : > { %p1369_p10 = pnand %p1368_p9, %p1362_p6 }
  0x54   : > { %1372 = shalt.err (!%p1369_p10)
}
  0x55   : > { %s1373_s17 = scalar_lea.vmem %s1642_s13, 384  ;;  %s1464_s23 = smov [#allocation2]  }
  0x56   : > { %p1374_p1 = scmp.ne.s32.totalorder %s1642_s13, %s1373_s17  ;;  %s1378_s10 = sshll.u32 %s1464_s23, 4  ;;  %s1379_s10 = int_to_ptr.vmem [resolvable:$false] %s1378_s10 }
  0x57   : > { %s1380_s8 = scalar_lea.vmem %s1379_s10, 768  ;;  %p1381_p2 = scmp.lt.s32.totalorder %s1642_s13, %s1379_s10 }
  0x58   : > { %p1376_p4 = pnand %p1374_p1, %p1360_p3  ;;  %p1382_p5 = scmp.lt.s32.totalorder %s1380_s8, %s1373_s17 }
  0x5a   : > { %p1377_p0 = pneg %p1376_p4  ;;  %p1383_p11 = por %p1382_p5, %p1381_p2 }
  0x5c   : > { %p1384_p12 = pnand %p1383_p11, %p1377_p0 }
  0x5e   : > { %1387 = shalt.err (!%p1384_p12)
}
  0x5f   : > { %s1465_s16 = smov 256   ;;  %s1856_s12 = smov 128  }
  0x60   : > { %1230 = dma.hbm_to_vmem [thread:$0]  (!%p1855_p8), %s1640_s28, 384, %s1642_s13, %s1644_s14, %s1465_s16, %s1856_s12, %s1463_s11  }
  0x61   : > { %p1857_p3 = scmp.ne.s32.totalorder %s1850_s7, 0 }
  0x62   : > { %s1677_s25 = sand.u32 (!%p1857_p3), 1, %s1450_s19   ;;  %p1858_p6 = scmp.ne.s32.totalorder (!%p1857_p3), %s1847_s29, 0 }
  0x63   : > { %230 = sbr.rel (%p1857_p3) target bundleno = 1562 (0x61a), region = 40  ;;  %s233_s9 = scalar_lea.sflag (!%p1857_p3), [#allocation3], %s1677_s25 }
  0x64   : > { %s1207_s26 = smul.u32 (!%p1857_p3), 24, %s1677_s25 }
  0x66   : > { %s1681_s17 = scalar_lea.vmem (!%p1857_p3), [#allocation2], %s1207_s26 }
  0x6a   : > { %1433 = dma.done.wait (%p1858_p6), %s233_s9, 384  }
  0x6b   : > { %1435 = vsyncadd (%p1858_p6), %s233_s9, 4294966912  ;;  %p1859_p8 = scmp.eq.s32.totalorder %s1526_s22, 0 }
  0x6d   : > { %1437 = dma.done.wait (%p1859_p8), [#allocation6], 2048   ;;  %p1860_p13 = pmov %p1859_p8 }
  0x6e   : > { %v1466_v0 = vmov 0.0   ;;  %vm1467_vm0 = vmmov 0   ;;  %v282_v1 = vld [vmem:[#allocation5 + $0x20] sm:$0xff]  ;;  %v283_v2 = vld [vmem:[#allocation5 + $0x28] sm:$0xff]  ;;  %v284_v6 = vld [vmem:[#allocation5 + $0x30] sm:$0xff]  ;;  %vm317_vm1 = vcmask 261120  }
  0x6f   : > { %1439 = vsyncadd (%p1860_p13), [#allocation6], 4294965248  ;;  %1134 = vmatprep.subr.bf16.mxu1 %v1466_v0  ;;  %1126 = vmatprep.subr.bf16.mxu0 %v1466_v0  ;;  %v278_v3 = vld [vmem:[#allocation5] sm:$0xff]  ;;  %v292_v4 = vpack.c.bf16 %v283_v2, %v282_v1  ;;  %v279_v5 = vld [vmem:[#allocation5 + $0x8] sm:$0xff]  ;;  %vm451_vm2 = vcmask 64512   ;;  %s1468_s28 = smov 112  }
  0x70   : > { %1138 = vmatprep.mubr.msk.bf16.mxu1 %vm1467_vm0, %v1466_v0  ;;  %1130 = vmatprep.mubr.msk.bf16.mxu0 %vm1467_vm0, %v1466_v0  ;;  %v285_v7 = vld [vmem:[#allocation5 + $0x38] sm:$0xff]  ;;  %v290_v8 = vpack.c.bf16 %v279_v5, %v278_v3  ;;  %v280_v9 = vld [vmem:[#allocation5 + $0x10] sm:$0xff]  ;;  %s1469_s13 = smov 120   ;;  %s1470_s14 = smov 104   ;;  %v286_v33 = vld [vmem:[#allocation5 + $0x40] sm:$0xff]  ;;  %vm513_vm3 = vcmask 1043456  }
  0x71   : > { %v281_v10 = vld [vmem:[#allocation5 + $0x18] sm:$0xff]  ;;  %1135 = vmatpush3.bf16.msra.mxu1 %v292_v4  ;;  %v293_v11 = vpack.c.bf16 %v285_v7, %v284_v6  ;;  %v272_v14 = vld [vmem:[%s1681_s17] sm:$0xff]  ;;  %s1471_s8 = smov 8   ;;  %s1472_s16 = smov 16   ;;  %vm903_vm4 = vcmask 130048   ;;  %vm905_vm5 = vcmask 195584  }
  0x72   : > { %v273_v12 = vld [vmem:[%s1681_s17 + $0x8] sm:$0xff]  ;;  %1127 = vmatpush3.bf16.msra.mxu0 %v290_v8  ;;  %1136 = vmatprep.subr.bf16.mxu1 %v1466_v0  ;;  %v291_v13 = vpack.c.bf16 %v281_v10, %v280_v9  ;;  %v275_v16 = vpack.c.bf16 %v272_v14, %v272_v14  ;;  %v287_v34 = vld [vmem:[#allocation5 + $0x48] sm:$0xff]  ;;  %v274_v39 = vld [vmem:[%s1681_s17 + $0x10] sm:$0xff]  ;;  %s1473_s12 = smov 24   ;;  %s1077_s26 = sshll.u32 %s1677_s25, 3 }
  0x73   : > { %1128 = vmatprep.subr.bf16.mxu0 %v1466_v0  ;;  %v276_v15 = vpack.c.bf16 %v273_v12, %v273_v12  ;;  %v1079_v17 = vld [vmem:[%s1836_s2 + $0x1] ss:$0 sm:$0xff]  ;;  %v1078_v18 = vld [vmem:[%s1836_s2] ss:$0 sm:$0xff]  ;;  %v294_v36 = vpack.c.bf16 %v287_v34, %v286_v33  ;;  %v289_v37 = vld [vmem:[#allocation5 + $0x58] sm:$0xff]  ;;  %v277_v40 = vpack.c.bf16 %v274_v39, %v274_v39  ;;  %s1095_s29 = sshll.u32 %s1526_s22, 7 }
  0x74   : > { %v288_v35 = vld [vmem:[#allocation5 + $0x50] sm:$0xff]  ;;  %s270_s7 = scalar_lea.vmem [#allocation8], %s1077_s26  ;;  %s966_s22 = scalar_lea.sflag [#allocation4], %s1677_s25 }
  0x75   : > { %1137 = vmatpush3.bf16.msra.mxu1 %v293_v11  ;;  %v295_v38 = vpack.c.bf16 %v289_v37, %v288_v35  ;;  %v1080_v55 = vld [vmem:[%s1836_s2 + $0x2] ss:$0 sm:$0xff]  ;;  %s979_s11 = sshll.u32 %s270_s7, 4  ;;  %p1861_p9 = scmp.ne.s32.totalorder %s1848_s30, 0  ;;  %s1791_s11 = int_to_ptr.vmem [resolvable:$true] %s979_s11 }
  0x76   : > { %1129 = vmatpush3.bf16.msra.mxu0 %v291_v13  ;;  %1150 = vmatprep.subr.bf16.mxu1 %v1466_v0  ;;  %s1474_s23 = smov [#allocation8]  }
  0x77   : > { %1142 = vmatprep.subr.bf16.mxu0 %v1466_v0  ;;  %s1392_s10 = sshll.u32 %s1474_s23, 4  ;;  %s1393_s10 = int_to_ptr.vmem [resolvable:$false] %s1392_s10 }
  0x78   : > { %1139 = vmatmul.mubr.msk.bf16.vlgmr.msra.gmra.mrb[0].mxu1 %vm317_vm1, %v276_v15  ;;  %p1395_p4 = scmp.lt.s32.totalorder %s1791_s11, %s1393_s10 }
  0x79   : > { %1131 = vmatmul.mubr.msk.bf16.vlgmr.msra.gmra.mrb[0].mxu0 %vm317_vm1, %v275_v16  ;;  %1152 = vmatprep.mubr.msk.bf16.mxu1 %vm1467_vm0, %v1466_v0 }
  0x7a   : > { %1146 = vmatprep.mubr.msk.bf16.mxu0 %vm1467_vm0, %v1466_v0  ;;  %1143 = vmatpush3.bf16.msra.mxu0 %v294_v36 }
  0x7b   : > { %1144 = vmatprep.subr.bf16.mxu0 %v1466_v0 }
  0x7e   : > { %1145 = vmatpush3.bf16.msra.mxu0 %v295_v38 }
  0x7f   : > { %1156 = vmatprep.subr.bf16.mxu0 %v1466_v0 }
  0x81   : > { %1147 = vmatmul.mubr.msk.bf16.vlgmr.msra.gmra.mrb[4].mxu0 %vm317_vm1, %v277_v40 }
  0x82   : > { %1158 = vmatprep.mubr.msk.bf16.mxu0 %vm1467_vm0, %v1466_v0 }
 0x14b   : > { %v398_v19 = vpop.f32.mrb[0].mxu1 }
 0x14c   : > { %v399_v20 = vadd.f32 %v1079_v17, %v398_v19  ;;  %v1140_v21 = vpop.f32.mrb[1].mxu1  ;;  %v355_v22 = vpop.f32.mrb[0].mxu0 }
 0x14d   : > { %v356_v23 = vadd.f32 %v1078_v18, %v355_v22  ;;  %v401_v24 = vpop.f32.mrb[2].mxu1  ;;  %v1132_v25 = vpop.f32.mrb[1].mxu0 }
 0x14e   : > { %v449_v26 = vpack.c.bf16 %v399_v20, %v399_v20  ;;  %v1141_v27 = vpop.f32.mrb[3].mxu1  ;;  %v358_v28 = vpop.f32.mrb[2].mxu0 }
 0x14f   : > { %v447_v29 = vmul.f32 0.35355338, %v356_v23  ;;  %v1133_v30 = vpop.f32.mrb[3].mxu0 }
 0x150   : > { %672 = vrot.lane.b32.xlu1 %v449_v26, %s1468_s28  ;;  %561 = vrot.lane.b32.xlu0 %v449_v26, %s1469_s13  ;;  %v456_v31 = vsel %vm451_vm2, %v449_v26, 0 }
 0x151   : > { %v448_v32 = vpack.c.bf16 %v447_v29, %v447_v29  ;;  %1151 = vmatpush3.bf16.xpose.msra.mxu1 %v456_v31 }
 0x152   : > { %1162 = vmatprep.subr.bf16.mxu1 %v1466_v0 }
 0x154   : > { %670 = vrot.lane.b32.xlu1 %v448_v32, %s1468_s28  ;;  %558 = vrot.lane.b32.xlu0 %v448_v32, %s1469_s13  ;;  %v441_v56 = vpop.f32.mrb[4].mxu0 }
 0x155   : > { %v442_v57 = vadd.f32 %v1080_v55, %v441_v56  ;;  %v1148_v58 = vpop.f32.mrb[5].mxu0 }
 0x156   : > { %v444_v59 = vpop.f32.mrb[6].mxu0 }
 0x157   : > { %v450_v60 = vpack.c.bf16 %v442_v57, %v442_v57  ;;  %v1149_v61 = vpop.f32.mrb[7].mxu0 }
 0x158   : > { %780 = vrot.lane.b32.xlu1 %v448_v32, %s1470_s14  ;;  %782 = vrot.lane.b32.xlu0 %v449_v26, %s1470_s14  ;;  %v908_v61 = vld [vmem:[#allocation7] sm:$0xff] }
 0x159   : > { %1153 = vmatmul.mubr.msk.bf16.vlgmr.msra.gmra.mrb[4].mxu1 %vm451_vm2, %v448_v32  ;;  %v515_v62 = vsel %vm513_vm3, %v450_v60, 0 }
 0x15a   : > { %1164 = vmatprep.mubr.msk.bf16.mxu1 %vm1467_vm0, %v1466_v0  ;;  %1157 = vmatpush3.bf16.msra.mxu0 %v515_v62  ;;  %v909_v62 = vld [vmem:[#allocation7 + $0x8] sm:$0xff] }
 0x15b   : > { %1168 = vmatprep.subr.bf16.mxu0 %v1466_v0 }
 0x1c2   : > { %v562_v41 = vpop.permute.xlu0 %561  ;;  %v673_v43 = vpop.permute.xlu1 %672 }
 0x1c3   : > { %v567_v42 = vsel %vm451_vm2, %v562_v41, 0  ;;  %v678_v45 = vsel %vm451_vm2, %v673_v43, 0 }
 0x1c4   : > { %1163 = vmatpush3.bf16.xpose.msra.mxu1 %v567_v42 }
 0x1c5   : > { %1174 = vmatprep.subr.bf16.mxu1 %v1466_v0 }
 0x1c6   : > { %v559_v44 = vpop.permute.xlu0 %558  ;;  %v671_v47 = vpop.permute.xlu1 %670 }
 0x1ca   : > { %v783_v46 = vpop.permute.xlu0 %782  ;;  %v781_v49 = vpop.permute.xlu1 %780 }
 0x1cb   : > { %1165 = vmatmul.mubr.msk.bf16.vlgmr.msra.gmra.mrb[8].mxu1 %vm451_vm2, %v559_v44  ;;  %v788_v48 = vsel %vm451_vm2, %v783_v46, 0 }
 0x1cc   : > { %1175 = vmatpush3.bf16.xpose.msra.mxu1 %v678_v45  ;;  %1176 = vmatprep.mubr.msk.bf16.mxu1 %vm1467_vm0, %v1466_v0 }
 0x1cd   : > { %1186 = vmatprep.subr.bf16.mxu1 %v1466_v0 }
 0x1d3   : > { %1177 = vmatmul.mubr.msk.bf16.vlgmr.msra.gmra.mrb[12].mxu1 %vm451_vm2, %v671_v47 }
 0x1d4   : > { %1187 = vmatpush3.bf16.xpose.msra.mxu1 %v788_v48  ;;  %1188 = vmatprep.mubr.msk.bf16.mxu1 %vm1467_vm0, %v1466_v0 }
 0x1d5   : > { %1198 = vmatprep.subr.bf16.mxu1 %v1466_v0 }
 0x1db   : > { %1189 = vmatmul.mubr.msk.bf16.vlgmr.msra.gmra.mrb[16].mxu1 %vm451_vm2, %v781_v49 }
 0x1dc   : > { %1202 = vmatprep.mubr.msk.bf16.mxu1 %vm1467_vm0, %v1466_v0 }
 0x22c   : > { %v492_v50 = vpop.f32.mrb[4].mxu1 }
 0x22d   : > { %v1154_v51 = vpop.f32.mrb[5].mxu1  ;;  %v498_v52 = vsel %vm451_vm2, %v492_v50, -inf }
 0x22e   : > { %499 = vmax.xlane.f32.xlu0 %v498_v52  ;;  %v495_v53 = vpop.f32.mrb[6].mxu1 }
 0x22f   : > { %v1155_v54 = vpop.f32.mrb[7].mxu1 }
 0x29e   : > { %v603_v63 = vpop.f32.mrb[8].mxu1 }
 0x29f   : > { %v1166_v1 = vpop.f32.mrb[9].mxu1  ;;  %v609_v2 = vsel %vm451_vm2, %v603_v63, -inf }
 0x2a0   : > { %610 = vmax.xlane.f32.xlu1 %v609_v2  ;;  %v606_v3 = vpop.f32.mrb[10].mxu1 }
 0x2a1   : > { %v1167_v4 = vpop.f32.mrb[11].mxu1 }
 0x2a6   : > { %v714_v5 = vpop.f32.mrb[12].mxu1 }
 0x2a7   : > { %v1178_v6 = vpop.f32.mrb[13].mxu1  ;;  %v720_v7 = vsel %vm451_vm2, %v714_v5, -inf }
 0x2a8   : > { %721 = vmax.xlane.f32.xlu0 %v720_v7  ;;  %v717_v8 = vpop.f32.mrb[14].mxu1  ;;  %v911_v6 = vld [vmem:[#allocation7 + $0x18] sm:$0xff] }
 0x2a9   : > { %v1179_v9 = vpop.f32.mrb[15].mxu1 }
 0x2ae   : > { %v824_v10 = vpop.f32.mrb[16].mxu1 }
 0x2af   : > { %v1190_v11 = vpop.f32.mrb[17].mxu1  ;;  %v830_v12 = vsel %vm451_vm2, %v824_v10, -inf }
 0x2b0   : > { %831 = vmax.xlane.f32.xlu0 %v830_v12  ;;  %v827_v13 = vpop.f32.mrb[18].mxu1 }
 0x2b1   : > { %v1191_v14 = vpop.f32.mrb[19].mxu1 }
 0x2bb   : > { %v500_v15 = vpop.xlane.xlu0 %499 }
 0x2bc   : > { %v501_v16 = vsub.f32 %v492_v50, %v500_v15 }
 0x2be   : > { %v502_v17 = vmul.f32 1.442695, %v501_v16 }
 0x2c0   : > { %1286 = vpow2.f32 %v502_v17 }
 0x2ca   : > { %v1287_v18 = vpop.eup %1286 }
 0x2cb   : > { %v504_v19 = vsel %vm451_vm2, %v1287_v18, 0.0 }
 0x2cc   : > { %505 = vadd.xlane.f32.xlu1 %v504_v19 }
 0x2dd   : > { %622 = vrot.lane.b32.xlu1 %v450_v60, %s1469_s13  ;;  %s1789_s13 = scalar_lea.hbm %s1839_s5, %s1095_s29 }
 0x32d   : > { %v611_v20 = vpop.xlane.xlu1 %610 }
 0x32e   : > { %v612_v21 = vsub.f32 %v603_v63, %v611_v20  ;;  %v912_v63 = vpack.c.bf16 %v909_v62, %v908_v61 }
 0x330   : > { %v613_v22 = vmul.f32 1.442695, %v612_v21  ;;  %1199 = vmatpush3.bf16.msra.mxu1 %v912_v63 }
 0x331   : > { %1200 = vmatprep.subr.bf16.mxu1 %v1466_v0 }
 0x332   : > { %1288 = vpow2.f32 %v613_v22  ;;  %v1092_v22 = vld [vmem:[%s1838_s4] ss:$0 sm:$0xff] }
 0x335   : > { %v722_v23 = vpop.xlane.xlu0 %721 }
 0x336   : > { %v723_v24 = vsub.f32 %v714_v5, %v722_v23  ;;  %v910_v5 = vld [vmem:[#allocation7 + $0x10] sm:$0xff] }
 0x337   : > { %v913_v7 = vpack.c.bf16 %v911_v6, %v910_v5 }
 0x338   : > { %v724_v25 = vmul.f32 1.442695, %v723_v24 }
 0x339   : > { %1201 = vmatpush3.bf16.msra.mxu1 %v913_v7 }
 0x33a   : > { %1290 = vpow2.f32 %v724_v25 }
 0x33c   : > { %v1289_v26 = vpop.eup %1288 }
 0x33d   : > { %v832_v27 = vpop.xlane.xlu0 %831  ;;  %v615_v28 = vsel %vm451_vm2, %v1289_v26, 0.0 }
 0x33e   : > { %v833_v29 = vsub.f32 %v824_v10, %v832_v27  ;;  %616 = vadd.xlane.f32.xlu0 %v615_v28 }
 0x340   : > { %v834_v30 = vmul.f32 1.442695, %v833_v29 }
 0x342   : > { %1292 = vpow2.f32 %v834_v30 }
 0x344   : > { %v1291_v31 = vpop.eup %1290 }
 0x345   : > { %v726_v32 = vsel %vm451_vm2, %v1291_v31, 0.0 }
 0x346   : > { %727 = vadd.xlane.f32.xlu1 %v726_v32 }
 0x34c   : > { %v1293_v33 = vpop.eup %1292 }
 0x34d   : > { %v836_v34 = vsel %vm451_vm2, %v1293_v33, 0.0 }
 0x34e   : > { %837 = vadd.xlane.f32.xlu0 %v836_v34 }
 0x357   : > { %842 = vrot.lane.b32.xlu1 %v450_v60, %s1470_s14  ;;  %s1388_s14 = scalar_lea.vmem %s1791_s11, 128 }
 0x358   : > { %p1389_p7 = scmp.ne.s32.totalorder %s1791_s11, %s1388_s14 }
 0x359   : > { %v506_v35 = vpop.xlane.xlu1 %505 }
 0x35a   : > { %1294 = vrcp.f32 %v506_v35  ;;  %p1390_p10 = pnand %p1389_p7, %p1861_p9 }
 0x35c   : > { %p1391_p1 = pneg %p1390_p10 }
 0x35d   : > { %v623_v37 = vpop.permute.xlu1 %622 }
 0x35e   : > { %v628_v40 = vsel %vm513_vm3, %v623_v37, 0 }
 0x364   : > { %v1295_v36 = vpop.eup %1294  ;;  %732 = vrot.lane.b32.xlu0 %v450_v60, %s1468_s28 }
 0x365   : > { %v508_v38 = vmul.f32 %v1295_v36, %v1287_v18 }
 0x367   : > { %v509_v39 = vpack.c.bf16 %v508_v38, %v508_v38 }
 0x369   : > { %1159 = vmatmul.mubr.msk.bf16.vlgmr.msra.gmra.mrb[8].mxu0 %vm451_vm2, %v509_v39 }
 0x36a   : > { %1169 = vmatpush3.bf16.msra.mxu0 %v628_v40  ;;  %1170 = vmatprep.mubr.msk.bf16.mxu0 %vm1467_vm0, %v1466_v0 }
 0x36b   : > { %1180 = vmatprep.subr.bf16.mxu0 %v1466_v0 }
 0x3cb   : > { %v617_v41 = vpop.xlane.xlu0 %616 }
 0x3cc   : > { %1296 = vrcp.f32 %v617_v41 }
 0x3d3   : > { %v728_v42 = vpop.xlane.xlu1 %727 }
 0x3d4   : > { %1298 = vrcp.f32 %v728_v42 }
 0x3d6   : > { %v1297_v43 = vpop.eup %1296 }
 0x3d7   : > { %v619_v44 = vmul.f32 %v1297_v43, %v1289_v26  ;;  %v843_v51 = vpop.permute.xlu1 %842 }
 0x3d8   : > { %v848_v53 = vsel %vm513_vm3, %v843_v51, 0 }
 0x3d9   : > { %v620_v45 = vpack.c.bf16 %v619_v44, %v619_v44 }
 0x3db   : > { %v838_v46 = vpop.xlane.xlu0 %837  ;;  %1171 = vmatmul.mubr.msk.bf16.vlgmr.msra.gmra.mrb[12].mxu0 %vm451_vm2, %v620_v45 }
 0x3dc   : > { %1300 = vrcp.f32 %v838_v46  ;;  %1182 = vmatprep.mubr.msk.bf16.mxu0 %vm1467_vm0, %v1466_v0 }
 0x3de   : > { %v1299_v47 = vpop.eup %1298 }
 0x3df   : > { %v730_v48 = vmul.f32 %v1299_v47, %v1291_v31  ;;  %v733_v49 = vpop.permute.xlu0 %732 }
 0x3e0   : > { %v738_v50 = vsel %vm513_vm3, %v733_v49, 0 }
 0x3e1   : > { %1181 = vmatpush3.bf16.msra.mxu0 %v738_v50  ;;  %v731_v52 = vpack.c.bf16 %v730_v48, %v730_v48 }
 0x3e2   : > { %1192 = vmatprep.subr.bf16.mxu0 %v1466_v0 }
 0x3e4   : > { %1183 = vmatmul.mubr.msk.bf16.vlgmr.msra.gmra.mrb[16].mxu0 %vm451_vm2, %v731_v52 }
 0x3e5   : > { %1193 = vmatpush3.bf16.msra.mxu0 %v848_v53  ;;  %1194 = vmatprep.mubr.msk.bf16.mxu0 %vm1467_vm0, %v1466_v0 }
 0x3e6   : > { %v1301_v54 = vpop.eup %1300 }
 0x3e7   : > { %v840_v55 = vmul.f32 %v1301_v54, %v1293_v33 }
 0x3e9   : > { %v841_v56 = vpack.c.bf16 %v840_v55, %v840_v55 }
 0x3ec   : > { %1195 = vmatmul.mubr.msk.bf16.vlgmr.msra.gmra.mrb[20].mxu0 %vm451_vm2, %v841_v56 }
 0x43c   : > { %v551_v57 = vpop.f32.mrb[8].mxu0 }
 0x43d   : > { %v1160_v58 = vpop.f32.mrb[9].mxu0 }
 0x43e   : > { %v554_v59 = vpop.f32.mrb[10].mxu0 }
 0x43f   : > { %v1161_v60 = vpop.f32.mrb[11].mxu0 }
 0x4ae   : > { %v664_v1 = vpop.f32.mrb[12].mxu0 }
 0x4af   : > { %891 = vrot.lane.b32.xlu1 %v664_v1, %s1471_s8  ;;  %v1172_v2 = vpop.f32.mrb[13].mxu0  ;;  %s1394_s8 = scalar_lea.vmem %s1393_s10, 256 }
 0x4b0   : > { %v667_v3 = vpop.f32.mrb[14].mxu0  ;;  %p1396_p0 = scmp.lt.s32.totalorder %s1394_s8, %s1388_s14 }
 0x4b1   : > { %v1173_v4 = vpop.f32.mrb[15].mxu0 }
 0x4b2   : > { %p1397_p2 = por %p1396_p0, %p1395_p4 }
 0x4b4   : > { %p1398_p5 = pnand %p1397_p2, %p1391_p1 }
 0x4b7   : > { %v774_v8 = vpop.f32.mrb[16].mxu0 }
 0x4b8   : > { %895 = vrot.lane.b32.xlu0 %v774_v8, %s1472_s16  ;;  %v1184_v9 = vpop.f32.mrb[17].mxu0 }
 0x4b9   : > { %v777_v10 = vpop.f32.mrb[18].mxu0 }
 0x4ba   : > { %v1185_v11 = vpop.f32.mrb[19].mxu0 }
 0x4bf   : > { %v884_v12 = vpop.f32.mrb[20].mxu0 }
 0x4c0   : > { %899 = vrot.lane.b32.xlu1 %v884_v12, %s1473_s12  ;;  %v1196_v13 = vpop.f32.mrb[21].mxu0 }
 0x4c1   : > { %v887_v14 = vpop.f32.mrb[22].mxu0 }
 0x4c2   : > { %v1197_v0 = vpop.f32.mrb[23].mxu0 }
 0x521   : > { %v892_v15 = vpop.permute.xlu1 %891 }
 0x522   : > { %v902_v17 = vsel %vm451_vm2, %v551_v57, %v892_v15 }
 0x52a   : > { %v896_v16 = vpop.permute.xlu0 %895 }
 0x52b   : > { %v904_v18 = vsel %vm903_vm4, %v902_v17, %v896_v16 }
 0x532   : > { %v900_v19 = vpop.permute.xlu1 %899 }
 0x533   : > { %v906_v20 = vsel %vm905_vm5, %v904_v18, %v900_v19 }
 0x534   : > { %v907_v21 = vpack.c.bf16 %v906_v20, %v906_v20 }
 0x536   : > { %1203 = vmatmul.mubr.msk.bf16.vlgmr.msra.gmra.mrb[20].mxu1 %vm317_vm1, %v907_v21 }
 0x609   : > { %v958_v23 = vpop.f32.mrb[20].mxu1 }
 0x60a   : > { %v959_v24 = vadd.f32 %v1092_v22, %v958_v23  ;;  %v1204_v25 = vpop.f32.mrb[21].mxu1 }
 0x60b   : > { %v961_v26 = vpop.f32.mrb[22].mxu1 }
 0x60c   : > { %v1205_v27 = vpop.f32.mrb[23].mxu1  ;;  %964 = vst.msk [vmem:[%s270_s7] sm:$0xff] %vm317_vm1, %v959_v24 }
 0x60d   : > { %1401 = shalt.err (!%p1398_p5)
}
 0x60e   : > { %s1402_s25 = scalar_lea.hbm %s1789_s13, 128  ;;  %s1406_s26 = scalar_lea.hbm %s1839_s5, 256 }
 0x60f   : > { %p1403_p11 = scmp.ne.s32.totalorder %s1789_s13, %s1402_s25  ;;  %p1407_p6 = scmp.lt.u32.totalorder %s1789_s13, %s1839_s5 }
 0x610   : > { %p1408_p8 = scmp.lt.u32.totalorder %s1406_s26, %s1402_s25  ;;  %p1410_p7 = scmp.lt.u32.totalorder %s1402_s25, %s1789_s13 }
 0x611   : > { %p1404_p12 = pnand %p1403_p11, %p1861_p9 }
 0x612   : > { %p1409_p13 = por %p1408_p8, %p1407_p6 }
 0x613   : > { %p1405_p3 = pneg %p1404_p12 }
 0x614   : > { %p1411_p10 = por %p1410_p7, %p1409_p13 }
 0x616   : > { %p1412_p1 = pnand %p1411_p10, %p1405_p3 }
 0x618   : > { %1415 = shalt.err (!%p1412_p1)
}
 0x619   : > { %1218 = dma.vmem_to_hbm [thread:$0]  (%p1861_p9), %s1791_s11, 128, %s1789_s13, %s966_s22  }
 0x61a PF: > { %s991_s29 = sand.u32 1, %s1446_s18   ;;  %p1862_p4 = scmp.ne.s32.totalorder %s1849_s6, 0 }
 0x61b   : > { %p1863_p0 = scmp.ge.s32.totalorder %s1458_s21, 2  ;;  %s992_s7 = scalar_lea.sflag [#allocation4], %s991_s29 }
 0x61d   : > { %p1232_p2 = pnand %p1863_p0, %p1862_p4 }
 0x61f   : > { %1441 = dma.done.wait (!%p1232_p2), %s992_s7, 128  }
 0x620   : > { %1443 = vsyncadd (!%p1232_p2), %s992_s7, 4294967168  ;;  %p19_p5 = scmp.ge.s32.totalorder %s1530_s24, 4   ;;  %s1864_s18 = smov %s1450_s19 }
 0x621   : > { %s1865_s19 = smov %s1454_s20  ;;  %s1866_s20 = smov %s1542_s27 }
 0x622   : > { %s1867_s21 = smov %s1530_s24  ;;  %21 = sbr.rel (!%p19_p5) target bundleno = 6 (0x6), region = 93 }
 0x629   :  { %997 = vsyncpa [#allocation3], 1 }
 0x62a   :  { %999 = vsyncpa [#allocation3 + $0x1], 1 }
 0x62b   :  { %1000 = vsyncpa [#allocation6], 1 }
 0x62c   :  { %1001 = vsyncpa [#allocation4], 1 }
 0x62d   :  { %1003 = vsyncpa [#allocation4 + $0x1], 1 }

</bundles_post_ra>
